<compile_context>
chip_gen: v6e
topology: v6e:2x2x1
jax: 0.10.0
libtpu: 0.0.40
codegen_flags: <defaults>
</compile_context>

<pallas_src>
import functools

import jax
import jax.numpy as jnp
from jax.experimental import pallas as pl
from jax.experimental.pallas import tpu as pltpu

LANE = 128
SUBLANE = 8
TM_MAX = 4096  # rows per block: f32 -> 2 MiB per stream per pipeline buffer


def _focal_loss_kernel(x_ref, t_ref, out_ref, *, gamma, rows_valid, rem, tm,
                       blocks_per_split, need_mask, hard_targets):
    c = pl.program_id(0)   # "parallel" axis (core split)
    i = pl.program_id(1)   # "arbitrary" axis (row-block reduction)

    @pl.when(i == 0)
    def _():
        out_ref[...] = jnp.zeros_like(out_ref)

    x = x_ref[...].astype(jnp.float32)
    t = t_ref[...].astype(jnp.float32)
    g = jnp.float32(gamma)

    if hard_targets:
        # 3 transcendentals/elem (exact only for t in {0,1}):
        #   z = x*(1-2t); s = softplus(z) = bce; logsigmoid(-x*(2t-1)) = z - s
        z = x * (1.0 - 2.0 * t)
        s = jnp.maximum(z, 0.0) + jnp.log1p(jnp.exp(-jnp.abs(z)))
        loss = jnp.exp(g * (z - s)) * s
    else:
        # General (soft-label) path, 5 transcendentals/elem, matches the
        # PyTorch module for arbitrary t.
        bce = jnp.maximum(x, 0.0) - x * t + jnp.log1p(jnp.exp(-jnp.abs(x)))
        w = x * (2.0 * t - 1.0)
        sp_w = jnp.maximum(w, 0.0) + jnp.log1p(jnp.exp(-jnp.abs(w)))  # softplus(w)
        loss = jnp.exp(-g * sp_w) * bce   # exp(logsigmoid(-w) * gamma) * bce

    def _accumulate(v):
        # Fold (tm,128) into the resident (8,128) accumulator: pure VPU adds,
        # no per-step cross-lane reduce.
        out_ref[...] += jnp.sum(v.reshape(tm // SUBLANE, SUBLANE, LANE), axis=0)

    if need_mask:
        row0 = (c * blocks_per_split + i) * tm

        @pl.when(row0 + tm > rows_valid)      # only block(s) holding the tail
        def _():
            row_g = row0 + jax.lax.broadcasted_iota(jnp.int32, (tm, LANE), 0)
            valid = row_g < rows_valid
            if rem:
                col = jax.lax.broadcasted_iota(jnp.int32, (tm, LANE), 1)
                valid = valid | ((row_g == rows_valid) & (col < rem))
            _accumulate(jnp.where(valid, loss, 0.0))

        @pl.when(row0 + tm <= rows_valid)     # mask-free fast path
        def _():
            _accumulate(loss)
    else:
        _accumulate(loss)


def _focal_elementwise(x, t, gamma, hard_targets):
    """Pure-jnp per-element focal loss (tiny-input fallback)."""
    x = x.astype(jnp.float32)
    t = t.astype(jnp.float32)
    g = jnp.float32(gamma)
    if hard_targets:
        z = x * (1.0 - 2.0 * t)
        s = jnp.maximum(z, 0.0) + jnp.log1p(jnp.exp(-jnp.abs(z)))
        return jnp.exp(g * (z - s)) * s
    bce = jnp.maximum(x, 0.0) - x * t + jnp.log1p(jnp.exp(-jnp.abs(x)))
    w = x * (2.0 * t - 1.0)
    sp_w = jnp.maximum(w, 0.0) + jnp.log1p(jnp.exp(-jnp.abs(w)))
    return jnp.exp(-g * sp_w) * bce


def focal_loss(x, target, gamma, *, hard_targets=False):
    if x.shape != target.shape:
        raise ValueError(
            "Target size ({}) must be the same as input size ({})".format(
                target.shape, x.shape
            )
        )
    n = x.size
    g = float(gamma)

    xf = x.reshape(-1)
    tf = target.reshape(-1)

    rows_valid = n // LANE     # number of fully valid 128-lane rows
    rem = n % LANE             # ragged sub-row tail

    # Tiny inputs (< one (8,128) tile of full rows): not worth a kernel launch.
    if rows_valid < SUBLANE:
        return jnp.sum(_focal_elementwise(xf, tf, g, hard_targets)) / jnp.float32(n)

    # Accept f32 / bf16 natively (bf16 halves HBM bytes); cast everything else.
    def _norm(a):
        return a if a.dtype in (jnp.float32, jnp.bfloat16) else a.astype(jnp.float32)
    xf = _norm(xf)
    tf = _norm(tf)
    sub = 16 if (xf.dtype == jnp.bfloat16 or tf.dtype == jnp.bfloat16) else SUBLANE
    if rows_valid < sub:       # too few rows for a bf16 (16,128) tile -> f32
        xf = xf.astype(jnp.float32)
        tf = tf.astype(jnp.float32)
        sub = SUBLANE

    rows_ceil = rows_valid + (1 if rem else 0)
    if rem:
        # Pad only the sub-row remainder (< 128 elems).  Lane-aligned inputs
        # (n % 128 == 0) reach pallas_call as a zero-copy reshape.
        pad = rows_ceil * LANE - n
        xf = jnp.pad(xf, (0, pad))
        tf = jnp.pad(tf, (0, pad))
    x2 = xf.reshape(rows_ceil, LANE)
    t2 = tf.reshape(rows_ceil, LANE)

    # --- tiling (all static Python ints) ---
    tm = min(TM_MAX, (rows_valid // sub) * sub)      # multiple of `sub`, <= rows
    nblocks = pl.cdiv(rows_ceil, tm)
    nsplit = 2 if nblocks >= 2 else 1                # shard row loop over 2 TCs (v7x)
    blocks_per_split = pl.cdiv(nblocks, nsplit)
    need_mask = not (rem == 0 and nsplit * blocks_per_split * tm == rows_valid)

    kernel = functools.partial(
        _focal_loss_kernel,
        gamma=g,
        rows_valid=rows_valid,
        rem=rem,
        tm=tm,
        blocks_per_split=blocks_per_split,
        need_mask=need_mask,
        hard_targets=hard_targets,
    )

    # Clamp the block index so a dummy block from an odd split never maps past
    # the array (it re-reads the last real block and is fully masked -> 0).
    in_idx = lambda c, i: (jnp.minimum(c * blocks_per_split + i, nblocks - 1), 0)

    transc_per = 3 if hard_targets else 5
    cost = pl.CostEstimate(
        flops=15 * n,
        transcendentals=transc_per * n,
        bytes_accessed=int(x2.size * x2.dtype.itemsize
                           + t2.size * t2.dtype.itemsize
                           + nsplit * SUBLANE * LANE * 4),
    )

    partials = pl.pallas_call(
        kernel,
        out_shape=jax.ShapeDtypeStruct((nsplit * SUBLANE, LANE), jnp.float32),
        grid_spec=pltpu.PrefetchScalarGridSpec(
            num_scalar_prefetch=0,
            grid=(nsplit, blocks_per_split),
            in_specs=[
                pl.BlockSpec((tm, LANE), in_idx),
                pl.BlockSpec((tm, LANE), in_idx),
            ],
            out_specs=pl.BlockSpec((SUBLANE, LANE), lambda c, i: (c, 0)),
        ),
        compiler_params=pltpu.CompilerParams(
            dimension_semantics=("parallel", "arbitrary"),
            vmem_limit_bytes=32 * 1024 * 1024,
        ),
        cost_estimate=cost,
    )(x2, t2)

    # Single tiny cross-lane reduce + mean in the wrapper (better f32 accuracy).
    return jnp.sum(partials) / jnp.float32(n)


def focal_loss_ref(x, target, gamma):
    """Direct transcription of the PyTorch FocalLoss.forward."""
    x = x.astype(jnp.float32)
    t = target.astype(jnp.float32)
    max_val = jnp.clip(-x, 0.0, None)
    loss = x - x * t + max_val + jnp.log(jnp.exp(-max_val) + jnp.exp(-x - max_val))
    invprobs = jax.nn.log_sigmoid(-x * (t * 2.0 - 1.0))
    loss = jnp.exp(invprobs * gamma) * loss
    return jnp.mean(loss)


if __name__ == "__main__":
    key = jax.random.PRNGKey(0)
    k1, k2, k3, k4 = jax.random.split(key, 4)
    gamma = 2.0

    # Case 1: hard {0,1} targets, lane-aligned segmentation-style logits.
    B, C, H, W = 2, 4, 16, 16
    logits = jax.random.normal(k1, (B, C, H, W), jnp.float32) * 2.0
    targets = (jax.random.uniform(k2, (B, C, H, W)) > 0.5).astype(jnp.float32)
    out1 = jax.block_until_ready(focal_loss(logits, targets, gamma, hard_targets=True))
    ref1 = focal_loss_ref(logits, targets, gamma)
    assert jnp.allclose(out1, ref1, rtol=1e-5, atol=1e-5), (out1, ref1)

    # Case 2: soft labels + ragged element count (exercises partial blocks,
    # the pl.when-gated tail mask and the 2-way core split).
    shape2 = (3, 5, 7, 11)   # 1155 elems -> 9 full rows + 3 tail elements
    logits2 = jax.random.normal(k3, shape2, jnp.float32) * 3.0
    targets2 = jax.random.uniform(k4, shape2, jnp.float32)
    out2 = jax.block_until_ready(focal_loss(logits2, targets2, gamma))
    ref2 = focal_loss_ref(logits2, targets2, gamma)
    assert jnp.allclose(out2, ref2, rtol=1e-5, atol=1e-5), (out2, ref2)

    print("KERNEL_OK")
</pallas_src>

<mosaic_0001>
module attributes {stable_mosaic.version = 11 : i64} {
  func.func @_focal_loss_kernel(%arg0: i32, %arg1: i32, %arg2: memref<16x128xf32, #tpu.memory_space<vmem>>, %arg3: memref<16x128xf32, #tpu.memory_space<vmem>>, %arg4: memref<8x128xf32, #tpu.memory_space<vmem>>) attributes {dimension_semantics = [#tpu.dimension_semantics<parallel>, #tpu.dimension_semantics<arbitrary>], iteration_bounds = array<i64: 1, 1>, scalar_prefetch = 0 : i64, scratch_operands = 0 : i64, tpu.core_type = #tpu.core_type<tc>, window_params = [{transform_indices = @transform_0, window_bounds = array<i64: 16, 128>}, {transform_indices = @transform_1, window_bounds = array<i64: 16, 128>}, {transform_indices = @transform_2, window_bounds = array<i64: 8, 128>}]} {
    %c0_i32 = arith.constant 0 : i32
    %0 = arith.cmpi eq, %arg1, %c0_i32 : i32
    %1 = arith.extui %0 : i1 to i32
    %c0_i32_0 = arith.constant 0 : i32
    %2 = arith.cmpi ne, %1, %c0_i32_0 : i32
    scf.if %2 {
      %cst_13 = arith.constant 0.000000e+00 : f32
      %28 = vector.broadcast %cst_13 : f32 to vector<8x128xf32>
      %c0_14 = arith.constant 0 : index
      %c0_15 = arith.constant 0 : index
      %29 = vector.load %arg4[%c0_14, %c0_15] : memref<8x128xf32, #tpu.memory_space<vmem>>, vector<8x128xf32>
      tpu.vector_store %arg4[%c0_14, %c0_15], %28 {strides = array<i32>} : memref<8x128xf32, #tpu.memory_space<vmem>>, vector<8x128xf32>,
    } else {
    }
    %c0 = arith.constant 0 : index
    %c0_1 = arith.constant 0 : index
    %3 = vector.load %arg2[%c0, %c0_1] : memref<16x128xf32, #tpu.memory_space<vmem>>, vector<16x128xf32>
    %c0_2 = arith.constant 0 : index
    %c0_3 = arith.constant 0 : index
    %4 = vector.load %arg3[%c0_2, %c0_3] : memref<16x128xf32, #tpu.memory_space<vmem>>, vector<16x128xf32>
    %cst = arith.constant 2.000000e+00 : f32
    %5 = vector.broadcast %cst : f32 to vector<16x128xf32>
    %6 = arith.mulf %5, %4 : vector<16x128xf32>
    %cst_4 = arith.constant 1.000000e+00 : f32
    %7 = vector.broadcast %cst_4 : f32 to vector<16x128xf32>
    %8 = arith.subf %7, %6 : vector<16x128xf32>
    %9 = arith.mulf %3, %8 : vector<16x128xf32>
    %cst_5 = arith.constant 0.000000e+00 : f32
    %10 = vector.broadcast %cst_5 : f32 to vector<16x128xf32>
    %11 = arith.maximumf %9, %10 : vector<16x128xf32>
    %12 = math.absf %9 : vector<16x128xf32>
    %cst_6 = arith.constant 0.000000e+00 : f32
    %13 = vector.broadcast %cst_6 : f32 to vector<16x128xf32>
    %14 = arith.subf %13, %12 : vector<16x128xf32>
    %15 = math.exp %14 : vector<16x128xf32>
    %16 = math.log1p %15 : vector<16x128xf32>
    %17 = arith.addf %11, %16 : vector<16x128xf32>
    %18 = arith.subf %9, %17 : vector<16x128xf32>
    %cst_7 = arith.constant 2.000000e+00 : f32
    %19 = vector.broadcast %cst_7 : f32 to vector<16x128xf32>
    %20 = arith.mulf %19, %18 : vector<16x128xf32>
    %21 = math.exp %20 : vector<16x128xf32>
    %22 = arith.mulf %21, %17 : vector<16x128xf32>
    %c0_8 = arith.constant 0 : index
    %c0_9 = arith.constant 0 : index
    %23 = vector.load %arg4[%c0_8, %c0_9] : memref<8x128xf32, #tpu.memory_space<vmem>>, vector<8x128xf32>
    %24 = vector.shape_cast %22 : vector<16x128xf32> to vector<2x8x128xf32>
    %cst_10 = arith.constant dense<0.000000e+00> : vector<8x128xf32>
    %25 = vector.multi_reduction <add>, %24, %cst_10 [0] : vector<2x8x128xf32> to vector<8x128xf32>
    %26 = arith.addf %23, %25 : vector<8x128xf32>
    %c0_11 = arith.constant 0 : index
    %c0_12 = arith.constant 0 : index
    %27 = vector.load %arg4[%c0_11, %c0_12] : memref<8x128xf32, #tpu.memory_space<vmem>>, vector<8x128xf32>
    tpu.vector_store %arg4[%c0_11, %c0_12], %26 {strides = array<i32>} : memref<8x128xf32, #tpu.memory_space<vmem>>, vector<8x128xf32>,
    return
  }
  func.func @transform_0(%arg0: i32, %arg1: i32) -> (i32, i32) {
    %c1_i32 = arith.constant 1 : i32
    %0 = arith.muli %arg0, %c1_i32 : i32
    %1 = arith.addi %0, %arg1 : i32
    %c0_i32 = arith.constant 0 : i32
    %2 = arith.minsi %1, %c0_i32 : i32
    %c0_i32_0 = arith.constant 0 : i32
    %c0_i32_1 = arith.constant 0 : i32
    return %2, %c0_i32_0 : i32, i32
  }
  func.func @transform_1(%arg0: i32, %arg1: i32) -> (i32, i32) {
    %c1_i32 = arith.constant 1 : i32
    %0 = arith.muli %arg0, %c1_i32 : i32
    %1 = arith.addi %0, %arg1 : i32
    %c0_i32 = arith.constant 0 : i32
    %2 = arith.minsi %1, %c0_i32 : i32
    %c0_i32_0 = arith.constant 0 : i32
    %c0_i32_1 = arith.constant 0 : i32
    return %2, %c0_i32_0 : i32, i32
  }
  func.func @transform_2(%arg0: i32, %arg1: i32) -> (i32, i32) {
    %c0_i32 = arith.constant 0 : i32
    %c0_i32_0 = arith.constant 0 : i32
    return %arg0, %c0_i32 : i32, i32
  }
}

</mosaic_0001>

<bundles_post_ra>
// kernel: tpu_custom_call.1
= control target key start
LH: loop header
LB: loop body
LE: loop exit
PB: predicated region body
PF: predicated region fallthrough
CT: control target
= control target key end

     0   :  { %7 = vsyncpa [#allocation3], 0  ;;  %s252_s0 = inlined_call_operand.hbm [shape: f32[16,128], index: 0, kind: input, shape index: {}]   ;;  %s253_s1 = inlined_call_operand.hbm [shape: f32[16,128], index: 1, kind: input, shape index: {}]   ;;  %s254_s2 = inlined_call_operand.hbm [shape: f32[8,128], index: 2, kind: output, shape index: {}]  }
   0x1   :  { %8 = vsyncpa [#allocation6], 0 }
   0x2   :  { %9 = vsyncpa [#allocation4], 0  ;;  %s223_s9 = smov [#allocation2]  }
   0x3   :  { %s21_s10 = sshll.u32 %s223_s9, 4  ;;  %s22_s10 = int_to_ptr.vmem [resolvable:$true] %s21_s10 }
   0x4   :  { %s165_s11 = scalar_lea.vmem %s22_s10, 256  ;;  %p170_p1 = scmp.lt.s32.totalorder %s22_s10, %s22_s10 }
   0x5   :  { %p166_p0 = scmp.ne.s32.totalorder %s22_s10, %s165_s11  ;;  %p171_p2 = scmp.lt.s32.totalorder %s165_s11, %s165_s11 }
   0x7   :  { %p172_p3 = por %p171_p2, %p170_p1 }
   0x9   :  { %p173_p4 = pnand %p172_p3, %p166_p0 }
   0xb   :  { %176 = shalt.err (!%p173_p4)
}
   0xc   :  { %s224_s12 = smov 128   ;;  %s225_s13 = smov 8  }
   0xd   :  { %27 = dma.hbm_to_vmem [thread:$0]  %s252_s0, 256, %s22_s10, [#allocation3], %s224_s12, %s224_s12, %s225_s13  }
   0xe   :  { %s226_s16 = smov [#allocation5]  }
   0xf   :  { %s39_s17 = sshll.u32 %s226_s16, 4  ;;  %s40_s17 = int_to_ptr.vmem [resolvable:$true] %s39_s17 }
  0x10   :  { %s185_s18 = scalar_lea.vmem %s40_s17, 256  ;;  %p190_p6 = scmp.lt.s32.totalorder %s40_s17, %s40_s17 }
  0x11   :  { %p186_p5 = scmp.ne.s32.totalorder %s40_s17, %s185_s18  ;;  %p191_p7 = scmp.lt.s32.totalorder %s185_s18, %s185_s18 }
  0x13   :  { %p192_p8 = por %p191_p7, %p190_p6 }
  0x15   :  { %p193_p9 = pnand %p192_p8, %p186_p5 }
  0x17   :  { %196 = shalt.err (!%p193_p9)
}
  0x18   :  { %45 = dma.hbm_to_vmem [thread:$0]  %s253_s1, 256, %s40_s17, [#allocation6], %s224_s12, %s224_s12, %s225_s13  }
  0x19   :  { %217 = dma.done.wait [#allocation3], 256  }
  0x1a   :  { %218 = vsyncadd [#allocation3], 4294967040 }
  0x1b   :  { %219 = dma.done.wait [#allocation6], 256  }
  0x1c   :  { %220 = vsyncadd [#allocation6], 4294967040  ;;  %v67_v0 = vld [vmem:[#allocation5] sm:$0xff]  ;;  %v68_v1 = vld [vmem:[#allocation5 + $0x8] sm:$0xff]  ;;  %s227_s0 = smov [#allocation7]  }
  0x1d   :  { %v69_v2 = vmul.f32 2.0, %v67_v0  ;;  %v65_v3 = vld [vmem:[#allocation2] sm:$0xff]  ;;  %v70_v4 = vmul.f32 2.0, %v68_v1  ;;  %v66_v5 = vld [vmem:[#allocation2 + $0x8] sm:$0xff]  ;;  %s125_s1 = sshll.u32 %s227_s0, 4  ;;  %s126_s1 = int_to_ptr.vmem [resolvable:$true] %s125_s1 }
  0x1e   :  { %s197_s21 = scalar_lea.vmem %s126_s1, 128  ;;  %p202_p11 = scmp.lt.s32.totalorder %s126_s1, %s126_s1 }
  0x1f   :  { %v71_v6 = vsub.f32 1.0, %v69_v2  ;;  %v72_v7 = vsub.f32 1.0, %v70_v4  ;;  %p198_p10 = scmp.ne.s32.totalorder %s126_s1, %s197_s21  ;;  %p203_p12 = scmp.lt.s32.totalorder %s197_s21, %s197_s21 }
  0x21   :  { %v73_v8 = vmul.f32 %v71_v6, %v65_v3  ;;  %v74_v9 = vmul.f32 %v72_v7, %v66_v5  ;;  %p204_p13 = por %p203_p12, %p202_p11 }
  0x23   :  { %v77_v10 = vand.u32 2147483647, %v73_v8  ;;  %v78_v11 = vand.u32 2147483647, %v74_v9  ;;  %v75_v28 = vmax.f32 %v73_v8, 0.0  ;;  %v76_v31 = vmax.f32 %v74_v9, 0.0  ;;  %p205_p0 = pnand %p204_p13, %p198_p10 }
  0x25   :  { %v79_v12 = vsub.f32 0.0, %v77_v10  ;;  %v80_v13 = vsub.f32 0.0, %v78_v11 }
  0x27   :  { %v81_v14 = vmul.f32 1.442695, %v79_v12  ;;  %v83_v15 = vmul.f32 1.442695, %v80_v13 }
  0x29   :  { %145 = vpow2.f32 %v81_v14 }
  0x2a   :  { %147 = vpow2.f32 %v83_v15 }
  0x36   :  { %v146_v16 = vpop.eup %145 }
  0x37   :  { %v148_v17 = vpop.eup %147  ;;  %v85_v18 = vadd.f32 1.0, %v146_v16  ;;  %v88_v20 = vmul.f32 -0.5, %v146_v16  ;;  %v91_v23 = vand.u32 2147483647, %v146_v16 }
  0x38   :  { %v94_v19 = vadd.f32 1.0, %v148_v17  ;;  %v97_v21 = vmul.f32 -0.5, %v148_v17  ;;  %v100_v25 = vand.u32 2147483647, %v148_v17 }
  0x39   :  { %149 = vlog2.f32 %v85_v18  ;;  %v89_v22 = vadd.f32 1.0, %v88_v20  ;;  %vm92_vm0 = vcmp.lt.f32.partialorder %v91_v23, 0.0004427343 }
  0x3a   :  { %151 = vlog2.f32 %v94_v19  ;;  %v98_v24 = vadd.f32 1.0, %v97_v21  ;;  %vm101_vm1 = vcmp.lt.f32.partialorder %v100_v25, 0.0004427343 }
  0x3b   :  { %v90_v26 = vmul.f32 %v146_v16, %v89_v22 }
  0x3c   :  { %v99_v29 = vmul.f32 %v148_v17, %v98_v24 }
  0x46   :  { %v150_v27 = vpop.eup %149 }
  0x47   :  { %v152_v30 = vpop.eup %151  ;;  %v87_v32 = vmul.f32 0.6931472, %v150_v27 }
  0x48   :  { %v96_v33 = vmul.f32 0.6931472, %v152_v30 }
  0x49   :  { %v93_v34 = vsel %vm92_vm0, %v90_v26, %v87_v32 }
  0x4a   :  { %v102_v35 = vsel %vm101_vm1, %v99_v29, %v96_v33  ;;  %v103_v36 = vadd.f32 %v93_v34, %v75_v28 }
  0x4b   :  { %v104_v37 = vadd.f32 %v102_v35, %v76_v31 }
  0x4c   :  { %v105_v38 = vsub.f32 %v73_v8, %v103_v36 }
  0x4d   :  { %v106_v39 = vsub.f32 %v74_v9, %v104_v37 }
  0x4e   :  { %v107_v40 = vmul.f32 2.0, %v105_v38 }
  0x4f   :  { %v108_v41 = vmul.f32 2.0, %v106_v39 }
  0x50   :  { %v109_v42 = vmul.f32 1.442695, %v107_v40 }
  0x51   :  { %v111_v43 = vmul.f32 1.442695, %v108_v41 }
  0x52   :  { %153 = vpow2.f32 %v109_v42 }
  0x53   :  { %155 = vpow2.f32 %v111_v43 }
  0x5f   :  { %v154_v44 = vpop.eup %153 }
  0x60   :  { %v156_v45 = vpop.eup %155  ;;  %v113_v46 = vmul.f32 %v154_v44, %v103_v36 }
  0x61   :  { %v114_v47 = vmul.f32 %v156_v45, %v104_v37 }
  0x63   :  { %v116_v48 = vadd.f32 %v114_v47, %v113_v46 }
  0x65   :  { %118 = vst [vmem:[#allocation7] sm:$0xff] %v116_v48 }
  0x66   :  { %208 = shalt.err (!%p205_p0)
}
  0x67   :  { %128 = dma.vmem_to_hbm [thread:$0]  %s126_s1, 128, %s254_s2, [#allocation4]  }
  0x68   :  { %221 = dma.done.wait [#allocation4], 128  }
  0x69   :  { %222 = vsyncadd [#allocation4], 4294967168 }
  0x6a   :  { %132 = vsyncpa [#allocation3], 1 }
  0x6b   :  { %133 = vsyncpa [#allocation6], 1 }
  0x6c   :  { %134 = vsyncpa [#allocation4], 1 }

</bundles_post_ra>
